<compile_context>
chip_gen: v7x
topology: tpu7x:2x2x1
jax: 0.10.0
libtpu: 0.0.40
codegen_flags: <defaults>
</compile_context>

<pallas_src>
import functools

import jax
import jax.numpy as jnp
import numpy as np
from jax import lax
from jax.experimental import pallas as pl
from jax.experimental.pallas import tpu as pltpu

N_DFT = 10                  # Dft1d(10, ...)
_PAD_K = 16                 # sublane-aligned offset of the sin rows in the fused basis
_DEFAULT_LANE_TILE = 16384  # batch columns per grid step (multiple of 128, >=1 MiB/step)
_VMEM_LIMIT_BYTES = 40 * 1024 * 1024  # natural-layout input blocks are lane-padded in VMEM

# Transposed-RHS contraction: y[k, b] = sum_t basis[k, t] * x[b, t]
_NT_DIM_NUMBERS = (((1,), (1,)), ((), ()))


def _round_up(a: int, b: int) -> int:
    return ((a + b - 1) // b) * b


def _cdiv(a: int, b: int) -> int:
    return (a + b - 1) // b


@functools.lru_cache(maxsize=None)
def _dft_basis_np(n: int = N_DFT, pad_k: int = _PAD_K) -> np.ndarray:
    """Fused, sublane-padded DFT basis, shape (2*pad_k, n), as numpy.

    Rows [0, n)            : cos(2*pi*k*t/n)
    Rows [pad_k, pad_k+n)  : sin(2*pi*k*t/n)   (sign irrelevant for amplitude)
    Remaining rows are zero, so both re/im slices start at a multiple of 8.
    """
    k = np.arange(n).reshape(n, 1).astype(np.float64)
    t = np.arange(n).reshape(1, n).astype(np.float64)
    ang = 2.0 * np.pi * k * t / n
    basis = np.zeros((2 * pad_k, n), dtype=np.float32)
    basis[:n, :] = np.cos(ang)
    basis[pad_k:pad_k + n, :] = np.sin(ang)
    return basis


def _amp_from_fused(y):
    # y: (2*_PAD_K, TB) fused cos/sin projections -> (N_DFT, TB) amplitudes.
    re = y[0:N_DFT, :]
    im = y[_PAD_K:_PAD_K + N_DFT, :]
    return jnp.sqrt(re * re + im * im)


def _dft1d_amp_kernel_nt(x_ref, basis_ref, o_ref):
    # x_ref:     (TB, N_DFT)     natural-layout batch rows (contiguous HBM DMA)
    # basis_ref: (2*_PAD_K, N_DFT) resident across the grid (constant index_map)
    # o_ref:     (N_DFT, TB)     lane-dense output tile
    x = x_ref[...]
    if x.dtype != jnp.float32:
        x = x.astype(jnp.float32)  # bf16 in HBM, f32 on the MXU
    y = lax.dot_general(basis_ref[...], x, dimension_numbers=_NT_DIM_NUMBERS,
                        preferred_element_type=jnp.float32)
    o_ref[...] = _amp_from_fused(y)


def _dft1d_amp_kernel_t(xt_ref, basis_ref, o_ref):
    # Fallback body: xt_ref is already (N_DFT, TB) lane-dense (wrapper transposed).
    x = xt_ref[...]
    if x.dtype != jnp.float32:
        x = x.astype(jnp.float32)
    y = jnp.dot(basis_ref[...], x, preferred_element_type=jnp.float32)
    o_ref[...] = _amp_from_fused(y)


def _pick_tile(batch: int, lane_tile: int) -> int:
    lane_tile = max(128, _round_up(lane_tile, 128))
    b128 = _round_up(max(batch, 1), 128)
    tile = min(lane_tile, b128)
    # Guarantee >= 2 grid steps whenever the batch allows it, so
    # dimension_semantics=("parallel",) can shard across both v7x TensorCores.
    if _cdiv(batch, tile) < 2 and b128 >= 256:
        tile = _round_up(_cdiv(b128, 2), 128)
    return tile


def _pallas_dft_amp(x2d: jax.Array, *, lane_tile: int) -> jax.Array:
    B = x2d.shape[0]
    tile = _pick_tile(B, lane_tile)
    grid = (_cdiv(B, tile),)
    basis = jnp.asarray(_dft_basis_np())

    common = dict(
        out_shape=jax.ShapeDtypeStruct((N_DFT, B), jnp.float32),
        grid=grid,
        out_specs=pl.BlockSpec((N_DFT, tile), lambda i: (0, i)),
        compiler_params=pltpu.CompilerParams(
            dimension_semantics=("parallel",),      # shard batch tiles across TCs (v7x)
            vmem_limit_bytes=_VMEM_LIMIT_BYTES,     # v5e default scoped VMEM is 16 MiB
        ),
    )
    basis_spec = pl.BlockSpec((2 * _PAD_K, N_DFT), lambda i: (0, 0))

    try:
        # Preferred path: no wrapper transpose/pad; layout swap happens on-chip
        # inside the MXU contraction (review suggestion).
        return pl.pallas_call(
            _dft1d_amp_kernel_nt,
            in_specs=[pl.BlockSpec((tile, N_DFT), lambda i: (i, 0)), basis_spec],
            **common,
        )(x2d, basis)
    except Exception:
        # Safety net if Mosaic rejects the transposed-RHS contraction on this
        # jax version: pre-transpose in XLA (one extra HBM pass) and reuse the
        # known-good lane-dense kernel. Still no pad / no output slice.
        xt = x2d.T  # (N_DFT, B)
        return pl.pallas_call(
            _dft1d_amp_kernel_t,
            in_specs=[pl.BlockSpec((N_DFT, tile), lambda i: (0, i)), basis_spec],
            **common,
        )(xt, basis)


def mock_nn_forward(x: jax.Array, *, lane_tile: int = _DEFAULT_LANE_TILE) -> jax.Array:
    """Pallas equivalent of MockNN.forward: |DFT| along the last dim (size 10)."""
    assert x.shape[-1] == N_DFT, f"last dim must be {N_DFT}"
    orig_shape = x.shape
    x2d = x.reshape(-1, N_DFT)
    if x2d.dtype != jnp.bfloat16:
        # Keep bf16 inputs as-is (halves HBM reads); everything else goes to f32.
        x2d = x2d.astype(jnp.float32)

    out_t = _pallas_dft_amp(x2d, lane_tile=lane_tile)   # (N_DFT, B), float32

    # Sole remaining layout op: restore the nn.Module's (..., 10) output
    # contract. A fused consumer should consume out_t (shape (10, B)) directly.
    return out_t.T.reshape(orig_shape)


if __name__ == "__main__":
    key = jax.random.PRNGKey(0)

    # Small shape consistent with Dft1d(10): batch=8, last dim=10.
    x = jax.random.normal(key, (8, N_DFT), dtype=jnp.float32)
    y = mock_nn_forward(x)
    jax.block_until_ready(y)
    ref = jnp.abs(jnp.fft.fft(x, axis=-1)).astype(jnp.float32)
    np.testing.assert_allclose(np.asarray(y), np.asarray(ref), rtol=1e-4, atol=1e-4)

    # Multi-step grid + ragged tail + >=2-step split with the default tile:
    # B=300 -> tile=256, grid=(2,), last block masks 212 garbage lanes on writeback.
    x2 = jax.random.normal(jax.random.PRNGKey(1), (4, 75, N_DFT), dtype=jnp.float32)
    y2 = mock_nn_forward(x2)
    jax.block_until_ready(y2)
    ref2 = jnp.abs(jnp.fft.fft(x2, axis=-1)).astype(jnp.float32)
    np.testing.assert_allclose(np.asarray(y2), np.asarray(ref2), rtol=1e-4, atol=1e-4)

    # bf16 passthrough path: input stays bf16 in HBM, upcast to f32 on-chip.
    x3 = jax.random.normal(jax.random.PRNGKey(2), (16, N_DFT), dtype=jnp.float32)
    x3_bf16 = x3.astype(jnp.bfloat16)
    y3 = mock_nn_forward(x3_bf16)
    jax.block_until_ready(y3)
    ref3 = jnp.abs(jnp.fft.fft(x3_bf16.astype(jnp.float32), axis=-1)).astype(jnp.float32)
    np.testing.assert_allclose(np.asarray(y3), np.asarray(ref3), rtol=1e-3, atol=1e-3)

    print("KERNEL_OK")
</pallas_src>

<mosaic_0001>
module attributes {stable_mosaic.version = 11 : i64} {
  func.func @_dft1d_amp_kernel_nt(%arg0: i32, %arg1: memref<128x10xf32, #tpu.memory_space<vmem>>, %arg2: memref<32x10xf32, #tpu.memory_space<vmem>>, %arg3: memref<10x128xf32, #tpu.memory_space<vmem>>) attributes {dimension_semantics = [#tpu.dimension_semantics<parallel>], iteration_bounds = array<i64: 1>, scalar_prefetch = 0 : i64, scratch_operands = 0 : i64, tpu.core_type = #tpu.core_type<tc>, window_params = [{transform_indices = @transform_0, window_bounds = array<i64: 128, 10>}, {pipeline_mode = #tpu.pipeline_mode<synchronous>, transform_indices = @transform_1, window_bounds = array<i64: 32, 10>}, {transform_indices = @transform_2, window_bounds = array<i64: 10, 128>}]} {
    %c0 = arith.constant 0 : index
    %c0_0 = arith.constant 0 : index
    %0 = vector.load %arg1[%c0, %c0_0] : memref<128x10xf32, #tpu.memory_space<vmem>>, vector<128x10xf32>
    %c0_1 = arith.constant 0 : index
    %c0_2 = arith.constant 0 : index
    %1 = vector.load %arg2[%c0_1, %c0_2] : memref<32x10xf32, #tpu.memory_space<vmem>>, vector<32x10xf32>
    %cst = arith.constant dense<0.000000e+00> : vector<32x128xf32>
    %2 = tpu.matmul %1, %0, %cst {dimension_numbers = #tpu.dot_dimension_numbers<[1], [1], [0], [0], [0, 0, 1, 0], [], []>} : vector<32x10xf32>, vector<128x10xf32>, vector<32x128xf32> -> vector<32x128xf32>
    %3 = vector.extract_strided_slice %2 {offsets = [0, 0], sizes = [10, 128], strides = [1, 1]} : vector<32x128xf32> to vector<10x128xf32>
    %4 = vector.extract_strided_slice %2 {offsets = [16, 0], sizes = [10, 128], strides = [1, 1]} : vector<32x128xf32> to vector<10x128xf32>
    %5 = arith.mulf %3, %3 : vector<10x128xf32>
    %6 = arith.mulf %4, %4 : vector<10x128xf32>
    %7 = arith.addf %5, %6 : vector<10x128xf32>
    %8 = math.sqrt %7 : vector<10x128xf32>
    %c0_3 = arith.constant 0 : index
    %c0_4 = arith.constant 0 : index
    %9 = vector.load %arg3[%c0_3, %c0_4] : memref<10x128xf32, #tpu.memory_space<vmem>>, vector<10x128xf32>
    tpu.vector_store %arg3[%c0_3, %c0_4], %8 {strides = array<i32>} : memref<10x128xf32, #tpu.memory_space<vmem>>, vector<10x128xf32>,
    return
  }
  func.func @transform_0(%arg0: i32) -> (i32, i32) {
    %c0_i32 = arith.constant 0 : i32
    %c0_i32_0 = arith.constant 0 : i32
    return %arg0, %c0_i32 : i32, i32
  }
  func.func @transform_1(%arg0: i32) -> (i32, i32) {
    %c0_i32 = arith.constant 0 : i32
    %c0_i32_0 = arith.constant 0 : i32
    %c0_i32_1 = arith.constant 0 : i32
    return %c0_i32, %c0_i32_0 : i32, i32
  }
  func.func @transform_2(%arg0: i32) -> (i32, i32) {
    %c0_i32 = arith.constant 0 : i32
    %c0_i32_0 = arith.constant 0 : i32
    return %c0_i32, %arg0 : i32, i32
  }
}

module attributes {stable_mosaic.version = 11 : i64} {
  func.func @_dft1d_amp_kernel_t(%arg0: i32, %arg1: memref<10x128xf32, #tpu.memory_space<vmem>>, %arg2: memref<32x10xf32, #tpu.memory_space<vmem>>, %arg3: memref<10x128xf32, #tpu.memory_space<vmem>>) attributes {dimension_semantics = [#tpu.dimension_semantics<parallel>], iteration_bounds = array<i64: 1>, scalar_prefetch = 0 : i64, scratch_operands = 0 : i64, tpu.core_type = #tpu.core_type<tc>, window_params = [{transform_indices = @transform_0, window_bounds = array<i64: 10, 128>}, {pipeline_mode = #tpu.pipeline_mode<synchronous>, transform_indices = @transform_1, window_bounds = array<i64: 32, 10>}, {transform_indices = @transform_2, window_bounds = array<i64: 10, 128>}]} {
    %c0 = arith.constant 0 : index
    %c0_0 = arith.constant 0 : index
    %0 = vector.load %arg1[%c0, %c0_0] : memref<10x128xf32, #tpu.memory_space<vmem>>, vector<10x128xf32>
    %c0_1 = arith.constant 0 : index
    %c0_2 = arith.constant 0 : index
    %1 = vector.load %arg2[%c0_1, %c0_2] : memref<32x10xf32, #tpu.memory_space<vmem>>, vector<32x10xf32>
    %cst = arith.constant dense<0.000000e+00> : vector<32x128xf32>
    %2 = tpu.matmul %1, %0, %cst {dimension_numbers = #tpu.dot_dimension_numbers<[1], [0], [0], [1], [0, 0, 1, 1], [], []>} : vector<32x10xf32>, vector<10x128xf32>, vector<32x128xf32> -> vector<32x128xf32>
    %3 = vector.extract_strided_slice %2 {offsets = [0, 0], sizes = [10, 128], strides = [1, 1]} : vector<32x128xf32> to vector<10x128xf32>
    %4 = vector.extract_strided_slice %2 {offsets = [16, 0], sizes = [10, 128], strides = [1, 1]} : vector<32x128xf32> to vector<10x128xf32>
    %5 = arith.mulf %3, %3 : vector<10x128xf32>
    %6 = arith.mulf %4, %4 : vector<10x128xf32>
    %7 = arith.addf %5, %6 : vector<10x128xf32>
    %8 = math.sqrt %7 : vector<10x128xf32>
    %c0_3 = arith.constant 0 : index
    %c0_4 = arith.constant 0 : index
    %9 = vector.load %arg3[%c0_3, %c0_4] : memref<10x128xf32, #tpu.memory_space<vmem>>, vector<10x128xf32>
    tpu.vector_store %arg3[%c0_3, %c0_4], %8 {strides = array<i32>} : memref<10x128xf32, #tpu.memory_space<vmem>>, vector<10x128xf32>,
    return
  }
  func.func @transform_0(%arg0: i32) -> (i32, i32) {
    %c0_i32 = arith.constant 0 : i32
    %c0_i32_0 = arith.constant 0 : i32
    return %c0_i32, %arg0 : i32, i32
  }
  func.func @transform_1(%arg0: i32) -> (i32, i32) {
    %c0_i32 = arith.constant 0 : i32
    %c0_i32_0 = arith.constant 0 : i32
    %c0_i32_1 = arith.constant 0 : i32
    return %c0_i32, %c0_i32_0 : i32, i32
  }
  func.func @transform_2(%arg0: i32) -> (i32, i32) {
    %c0_i32 = arith.constant 0 : i32
    %c0_i32_0 = arith.constant 0 : i32
    return %c0_i32, %arg0 : i32, i32
  }
}

</mosaic_0001>

<bundles_post_ra>
// kernel: tpu_custom_call.1
= control target key start
LH: loop header
LB: loop body
LE: loop exit
PB: predicated region body
PF: predicated region fallthrough
CT: control target
= control target key end

     0   :  { %vm31_vm0 = vcmask 80896   ;;  %s504_s0 = inlined_call_operand.vmem [shape: f32[8,10], index: 0, kind: input, shape index: {}]   ;;  %s505_s1 = inlined_call_operand.vmem [shape: f32[32,10], index: 1, kind: input, shape index: {}]   ;;  %s506_s2 = inlined_call_operand.vmem [shape: f32[10,8], index: 2, kind: output, shape index: {}]  }
   0x1   :  { %v11_v0 = vld [vmem:[%s504_s0] sm:$0xff]  ;;  %v12_v1 = vld [vmem:[%s504_s0 + $0x8] sm:$0xff]  ;;  %vm372_vm1 = vmpackc.low %vm31_vm0, %vm31_vm0 }
   0x2   :  { %v281_v3 = vpack.c.bf16 %v12_v1, %v11_v0  ;;  %v13_v4 = vld [vmem:[%s504_s0 + $0x10] sm:$0xff]  ;;  %v14_v5 = vld [vmem:[%s504_s0 + $0x18] sm:$0xff]  ;;  %v27_v7 = vld [vmem:[%s505_s1] sm:$0xff] }
   0x3   :  { %v287_v6 = vpack.c.bf16 %v14_v5, %v13_v4  ;;  %v15_v8 = vld [vmem:[%s504_s0 + $0x20] sm:$0xff]  ;;  %v16_v9 = vld [vmem:[%s504_s0 + $0x28] sm:$0xff]  ;;  %275 = vmatprep.mubr.msk.f32.mxu0 %vm31_vm0, %v27_v7  ;;  %v29_v10 = vld [vmem:[%s505_s1 + $0x10] sm:$0xff] }
   0x4   :  { %283 = vmatprep.subr.msk.bf16.mxu0 %vm372_vm1, %v281_v3  ;;  %329 = vmatprep.subr.msk.bf16.mxu1 %vm372_vm1, %v281_v3  ;;  %v293_v11 = vpack.c.bf16 %v16_v9, %v15_v8  ;;  %v17_v12 = vld [vmem:[%s504_s0 + $0x30] sm:$0xff]  ;;  %v18_v13 = vld [vmem:[%s504_s0 + $0x38] sm:$0xff]  ;;  %v19_v15 = vld [vmem:[%s504_s0 + $0x40] sm:$0xff] }
   0x5   :  { %286 = vmatpush3.bf16.xpose.msk.msra.mxu0 %vm372_vm1, %v281_v3  ;;  %337 = vmatpush3.bf16.xpose.msk.msra.mxu1 %vm372_vm1, %v281_v3  ;;  %v299_v14 = vpack.c.bf16 %v18_v13, %v17_v12  ;;  %v20_v16 = vld [vmem:[%s504_s0 + $0x48] sm:$0xff]  ;;  %v21_v18 = vld [vmem:[%s504_s0 + $0x50] sm:$0xff]  ;;  %v22_v19 = vld [vmem:[%s504_s0 + $0x58] sm:$0xff] }
   0x6   :  { %289 = vmatprep.subr.msk.bf16.mxu0 %vm372_vm1, %v287_v6  ;;  %330 = vmatprep.subr.msk.bf16.mxu1 %vm372_vm1, %v287_v6  ;;  %v305_v17 = vpack.c.bf16 %v20_v16, %v19_v15  ;;  %v311_v20 = vpack.c.bf16 %v22_v19, %v21_v18  ;;  %v23_v21 = vld [vmem:[%s504_s0 + $0x60] sm:$0xff]  ;;  %v24_v22 = vld [vmem:[%s504_s0 + $0x68] sm:$0xff]  ;;  %v25_v24 = vld [vmem:[%s504_s0 + $0x70] sm:$0xff] }
   0x7   :  { %278 = vmatprep.mubr.msk.f32.mxu1 %vm31_vm0, %v29_v10  ;;  %v317_v23 = vpack.c.bf16 %v24_v22, %v23_v21  ;;  %v26_v25 = vld [vmem:[%s504_s0 + $0x78] sm:$0xff]  ;;  %v28_v27 = vld [vmem:[%s505_s1 + $0x8] sm:$0xff] }
   0x8   :  { %v323_v26 = vpack.c.bf16 %v26_v25, %v25_v24  ;;  %v30_v28 = vld [vmem:[%s505_s1 + $0x18] sm:$0xff] }
   0xd   :  { %292 = vmatpush3.bf16.xpose.msk.msra.mxu0 %vm372_vm1, %v287_v6  ;;  %338 = vmatpush3.bf16.xpose.msk.msra.mxu1 %vm372_vm1, %v287_v6 }
   0xe   :  { %295 = vmatprep.subr.msk.bf16.mxu0 %vm372_vm1, %v293_v11  ;;  %331 = vmatprep.subr.msk.bf16.mxu1 %vm372_vm1, %v293_v11 }
  0x15   :  { %298 = vmatpush3.bf16.xpose.msk.msra.mxu0 %vm372_vm1, %v293_v11  ;;  %339 = vmatpush3.bf16.xpose.msk.msra.mxu1 %vm372_vm1, %v293_v11 }
  0x16   :  { %301 = vmatprep.subr.msk.bf16.mxu0 %vm372_vm1, %v299_v14  ;;  %332 = vmatprep.subr.msk.bf16.mxu1 %vm372_vm1, %v299_v14 }
  0x1d   :  { %304 = vmatpush3.bf16.xpose.msk.msra.mxu0 %vm372_vm1, %v299_v14  ;;  %340 = vmatpush3.bf16.xpose.msk.msra.mxu1 %vm372_vm1, %v299_v14 }
  0x1e   :  { %307 = vmatprep.subr.msk.bf16.mxu0 %vm372_vm1, %v305_v17  ;;  %333 = vmatprep.subr.msk.bf16.mxu1 %vm372_vm1, %v305_v17 }
  0x25   :  { %310 = vmatpush3.bf16.xpose.msk.msra.mxu0 %vm372_vm1, %v305_v17  ;;  %341 = vmatpush3.bf16.xpose.msk.msra.mxu1 %vm372_vm1, %v305_v17 }
  0x26   :  { %313 = vmatprep.subr.msk.bf16.mxu0 %vm372_vm1, %v311_v20  ;;  %334 = vmatprep.subr.msk.bf16.mxu1 %vm372_vm1, %v311_v20 }
  0x2d   :  { %316 = vmatpush3.bf16.xpose.msk.msra.mxu0 %vm372_vm1, %v311_v20  ;;  %342 = vmatpush3.bf16.xpose.msk.msra.mxu1 %vm372_vm1, %v311_v20 }
  0x2e   :  { %319 = vmatprep.subr.msk.bf16.mxu0 %vm372_vm1, %v317_v23  ;;  %335 = vmatprep.subr.msk.bf16.mxu1 %vm372_vm1, %v317_v23 }
  0x35   :  { %322 = vmatpush3.bf16.xpose.msk.msra.mxu0 %vm372_vm1, %v317_v23  ;;  %343 = vmatpush3.bf16.xpose.msk.msra.mxu1 %vm372_vm1, %v317_v23 }
  0x36   :  { %325 = vmatprep.subr.msk.bf16.mxu0 %vm372_vm1, %v323_v26  ;;  %336 = vmatprep.subr.msk.bf16.mxu1 %vm372_vm1, %v323_v26 }
  0x3d   :  { %328 = vmatpush3.bf16.xpose.msk.msra.mxu0 %vm372_vm1, %v323_v26  ;;  %344 = vmatpush3.bf16.xpose.msk.msra.mxu1 %vm372_vm1, %v323_v26 }
  0x44   :  { %276 = vmatmul.mubr.msk.f32.vlgmr.msra.gmra.mrb[0].mxu0 %vm31_vm0, %v28_v27  ;;  %279 = vmatmul.mubr.msk.f32.vlgmr.msra.gmra.mrb[0].mxu1 %vm31_vm0, %v30_v28 }
 0x117   :  { %v277_v29 = vpop.f32.mrb[0].mxu0  ;;  %v280_v30 = vpop.f32.mrb[0].mxu1 }
 0x118   :  { %v178_v31 = vmul.f32 %v277_v29, %v277_v29  ;;  %v180_v32 = vmul.f32 %v280_v30, %v280_v30  ;;  %v158_v33 = vpop.f32.mrb[1].mxu0  ;;  %v168_v34 = vpop.f32.mrb[1].mxu1 }
 0x119   :  { %v177_v35 = vmul.f32 %v158_v33, %v158_v33  ;;  %v179_v36 = vmul.f32 %v168_v34, %v168_v34 }
 0x11a   :  { %v182_v37 = vadd.f32 %v180_v32, %v178_v31 }
 0x11b   :  { %v181_v38 = vadd.f32 %v179_v36, %v177_v35 }
 0x11c   :  { %345 = vrsqrt.f32 %v182_v37  ;;  %vm192_vm2 = vcmp.eq.f32.partialorder %v182_v37, inf  ;;  %v195_v42 = vand.u32 2147483648, %v182_v37  ;;  %vm194_vm3 = vcmp.eq.f32.partialorder %v182_v37, 0.0 }
 0x11d   :  { %347 = vrsqrt.f32 %v181_v38  ;;  %vm185_vm4 = vcmp.eq.f32.partialorder %v181_v38, inf  ;;  %v188_v45 = vand.u32 2147483648, %v181_v38  ;;  %vm187_vm5 = vcmp.eq.f32.partialorder %v181_v38, 0.0 }
 0x126   :  { %v346_v39 = vpop.eup %345 }
 0x127   :  { %v348_v40 = vpop.eup %347  ;;  %v191_v41 = vmul.f32 %v346_v39, %v182_v37 }
 0x128   :  { %v184_v43 = vmul.f32 %v348_v40, %v181_v38 }
 0x129   :  { %v193_v44 = vsel %vm192_vm2, %v182_v37, %v191_v41 }
 0x12a   :  { %v196_v46 = vsel %vm194_vm3, %v195_v42, %v193_v44  ;;  %v186_v47 = vsel %vm185_vm4, %v181_v38, %v184_v43 }
 0x12b   :  { %198 = vst [vmem:[%s506_s2 + $0x8] sm:$0x3] %v196_v46  ;;  %v189_v48 = vsel %vm187_vm5, %v188_v45, %v186_v47 }
 0x12c   :  { %197 = vst [vmem:[%s506_s2] sm:$0xff] %v189_v48 }

// kernel: tpu_custom_call.1
= control target key start
LH: loop header
LB: loop body
LE: loop exit
PB: predicated region body
PF: predicated region fallthrough
CT: control target
= control target key end

     0   :  { %vm30_vm0 = vcmask 1041408   ;;  %vm17_vm1 = vcmask 80896   ;;  %vm179_vm2 = vmmov 1   ;;  %s223_s0 = inlined_call_operand.vmem [shape: f32[10,8], index: 0, kind: input, shape index: {}]   ;;  %s224_s1 = inlined_call_operand.vmem [shape: f32[32,10], index: 1, kind: input, shape index: {}]   ;;  %s225_s2 = inlined_call_operand.vmem [shape: f32[10,8], index: 2, kind: output, shape index: {}]  }
   0x1   :  { %v11_v0 = vld [vmem:[%s223_s0] sm:$0xff]  ;;  %v12_v1 = vld [vmem:[%s223_s0 + $0x8] sm:$0x3]  ;;  %vm167_vm3 = vmpackc.low %vm30_vm0, %vm179_vm2 }
   0x2   :  { %v166_v2 = vpack.c.bf16 %v12_v1, %v11_v0  ;;  %v13_v3 = vld [vmem:[%s224_s1] sm:$0xff]  ;;  %v15_v4 = vld [vmem:[%s224_s1 + $0x10] sm:$0xff]  ;;  %v14_v5 = vld [vmem:[%s224_s1 + $0x8] sm:$0xff] }
   0x3   :  { %160 = vmatprep.mubr.msk.f32.mxu0 %vm17_vm1, %v13_v3  ;;  %163 = vmatprep.mubr.msk.f32.mxu1 %vm17_vm1, %v15_v4  ;;  %v16_v6 = vld [vmem:[%s224_s1 + $0x18] sm:$0xff] }
   0x4   :  { %168 = vmatprep.subr.msk.bf16.mxu0 %vm167_vm3, %v166_v2  ;;  %172 = vmatprep.subr.msk.bf16.mxu1 %vm167_vm3, %v166_v2 }
   0x5   :  { %171 = vmatpush3.bf16.msk.msra.mxu0 %vm167_vm3, %v166_v2  ;;  %173 = vmatpush3.bf16.msk.msra.mxu1 %vm167_vm3, %v166_v2 }
   0x8   :  { %161 = vmatmul.mubr.msk.f32.vlgmr.msra.gmra.mrb[0].mxu0 %vm17_vm1, %v14_v5  ;;  %164 = vmatmul.mubr.msk.f32.vlgmr.msra.gmra.mrb[0].mxu1 %vm17_vm1, %v16_v6 }
  0xdb   :  { %v162_v7 = vpop.f32.mrb[0].mxu0  ;;  %v165_v8 = vpop.f32.mrb[0].mxu1 }
  0xdc   :  { %v120_v9 = vmul.f32 %v162_v7, %v162_v7  ;;  %v122_v10 = vmul.f32 %v165_v8, %v165_v8  ;;  %v100_v11 = vpop.f32.mrb[1].mxu0  ;;  %v110_v12 = vpop.f32.mrb[1].mxu1 }
  0xdd   :  { %v119_v13 = vmul.f32 %v100_v11, %v100_v11  ;;  %v121_v14 = vmul.f32 %v110_v12, %v110_v12 }
  0xde   :  { %v124_v15 = vadd.f32 %v122_v10, %v120_v9 }
  0xdf   :  { %v123_v16 = vadd.f32 %v121_v14, %v119_v13 }
  0xe0   :  { %175 = vrsqrt.f32 %v124_v15  ;;  %vm134_vm4 = vcmp.eq.f32.partialorder %v124_v15, inf  ;;  %v137_v20 = vand.u32 2147483648, %v124_v15  ;;  %vm136_vm5 = vcmp.eq.f32.partialorder %v124_v15, 0.0 }
  0xe1   :  { %177 = vrsqrt.f32 %v123_v16  ;;  %vm127_vm6 = vcmp.eq.f32.partialorder %v123_v16, inf  ;;  %v130_v23 = vand.u32 2147483648, %v123_v16  ;;  %vm129_vm7 = vcmp.eq.f32.partialorder %v123_v16, 0.0 }
  0xea   :  { %v176_v17 = vpop.eup %175 }
  0xeb   :  { %v178_v18 = vpop.eup %177  ;;  %v133_v19 = vmul.f32 %v176_v17, %v124_v15 }
  0xec   :  { %v126_v21 = vmul.f32 %v178_v18, %v123_v16 }
  0xed   :  { %v135_v22 = vsel %vm134_vm4, %v124_v15, %v133_v19 }
  0xee   :  { %v138_v24 = vsel %vm136_vm5, %v137_v20, %v135_v22  ;;  %v128_v25 = vsel %vm127_vm6, %v123_v16, %v126_v21 }
  0xef   :  { %140 = vst [vmem:[%s225_s2 + $0x8] sm:$0x3] %v138_v24  ;;  %v131_v26 = vsel %vm129_vm7, %v130_v23, %v128_v25 }
  0xf0   :  { %139 = vst [vmem:[%s225_s2] sm:$0xff] %v131_v26 }

</bundles_post_ra>
